<compile_context>
chip_gen: v5e
topology: v5e:2x2
jax: 0.10.0
libtpu: 0.0.40
codegen_flags: <defaults>
</compile_context>

<pallas_src>
import functools

import jax
import jax.numpy as jnp
from jax.experimental import pallas as pl
from jax.experimental.pallas import tpu as pltpu

LANE = 128  # TPU vreg lane width (fast, last dim)


def _leaky_hardtanh_kernel(x_ref, o_ref, *, min_val, max_val, slope):
    x = x_ref[...]
    dt = x.dtype
    min_v = jnp.asarray(min_val, dt)
    max_v = jnp.asarray(max_val, dt)
    slope_v = jnp.asarray(slope, dt)
    xs = x * slope_v  # shared by both branches
    # Exactly mirror the PyTorch forward: two sequential torch.where calls.
    y = jnp.where(x < min_v, min_v + xs, x)
    y = jnp.where(x > max_v, max_v + xs, y)
    o_ref[...] = y


def _round_up(a, b):
    return ((a + b - 1) // b) * b


def leaky_hardtanh(x, min_val=-1.0, max_val=1.0, slope=0.01, *, donate_input=False):
    """Pallas TPU leaky_hardtanh. Elementwise; any shape / float dtype.

    donate_input=True aliases the output onto the input buffer
    (pair with jit donation of `x`) to avoid a second full-size HBM allocation.
    """
    orig_shape = x.shape
    dtype = x.dtype
    n = x.size
    if n == 0:
        return x

    itemsize = jnp.dtype(dtype).itemsize
    # dtype-aware sublane packing: f32 -> 8, bf16/fp16 -> 16, int8/fp8 -> 32.
    sub = max(8, 32 // itemsize)

    flat = x.reshape(-1)  # contiguous reshape: no HBM copy
    rem = n % LANE
    padded = rem != 0
    if padded:
        # Pad at most LANE-1 elements so the lane dim divides exactly.
        flat = jnp.pad(flat, (0, LANE - rem))
    rows = flat.shape[0] // LANE
    x2d = flat.reshape(rows, LANE)  # contiguous reshape: no HBM copy

    # ~4 MiB per block => (in + out) x double-buffering ~ 16 MiB VMEM,
    # within the 32 MiB scoped limit on v5e/v6e/v7x and at the HBM-roofline knee.
    target_block_bytes = 4 * 1024 * 1024
    max_tile_rows = max(sub, (target_block_bytes // (LANE * itemsize)) // sub * sub)

    if rows <= sub:
        # Tiny input: one block equal to the full array dims (allowed by Mosaic).
        tile_rows = rows
    elif rows <= max_tile_rows:
        # Mid-sized input: split into >= 2 sublane-aligned blocks so both
        # TensorCores (v7x) get work via the parallel grid axis.
        tile_rows = max(sub, _round_up(pl.cdiv(rows, 2), sub))
        tile_rows = min(tile_rows, (rows // sub) * sub)
    else:
        tile_rows = max_tile_rows

    # Ragged last block is handled by Pallas (masked OOB writes) — no
    # tile-shrinking fallback and no extra full-array padding pass.
    grid = (pl.cdiv(rows, tile_rows),)

    kernel = functools.partial(
        _leaky_hardtanh_kernel,
        min_val=float(min_val), max_val=float(max_val), slope=float(slope),
    )

    out2d = pl.pallas_call(
        kernel,
        out_shape=jax.ShapeDtypeStruct((rows, LANE), dtype),
        grid_spec=pltpu.PrefetchScalarGridSpec(
            num_scalar_prefetch=0,
            grid=grid,
            in_specs=[pl.BlockSpec((tile_rows, LANE), lambda i: (i, 0))],
            out_specs=pl.BlockSpec((tile_rows, LANE), lambda i: (i, 0)),
        ),
        compiler_params=pltpu.CompilerParams(
            dimension_semantics=("parallel",),
            vmem_limit_bytes=32 * 1024 * 1024,  # safe on v5e/v6e/v7x
        ),
        input_output_aliases=({0: 0} if donate_input else {}),
    )(x2d)

    out = out2d.reshape(-1)
    if padded:
        out = out[:n]
    return out.reshape(orig_shape)


def leaky_hardtanh_ref(x, min_val=-1.0, max_val=1.0, slope=0.01):
    x = jnp.where(x < min_val, min_val + x * slope, x)
    x = jnp.where(x > max_val, max_val + x * slope, x)
    return x


if __name__ == "__main__":
    key = jax.random.PRNGKey(0)
    k1, k2 = jax.random.split(key)

    # Primary test: NCHW shape implied by the module (batch=2, channels=4, 16x16).
    # Scale so values fall outside [-1, 1] and exercise both where branches.
    x = jax.random.normal(k1, (2, 4, 16, 16), dtype=jnp.float32) * 3.0
    out = jax.block_until_ready(leaky_hardtanh(x))
    ref = leaky_hardtanh_ref(x)
    assert out.shape == x.shape and out.dtype == x.dtype
    assert jnp.allclose(out, ref, atol=1e-6, rtol=1e-6), "f32 mismatch vs reference"

    # Ragged path: n % 128 != 0 (minimal pad) and rows not a multiple of the tile
    # (exercises the cdiv grid with a masked last block).
    x_ragged = jax.random.normal(k2, (3, 5, 7, 13), dtype=jnp.float32) * 3.0
    out_r = jax.block_until_ready(leaky_hardtanh(x_ragged))
    ref_r = leaky_hardtanh_ref(x_ragged)
    assert out_r.shape == x_ragged.shape
    assert jnp.allclose(out_r, ref_r, atol=1e-6, rtol=1e-6), "ragged mismatch"

    # bf16 path (dtype-aware sublane tiling).
    x_bf16 = (jax.random.normal(k1, (2, 4, 16, 16), dtype=jnp.float32) * 3.0).astype(jnp.bfloat16)
    out_b = jax.block_until_ready(leaky_hardtanh(x_bf16))
    ref_b = leaky_hardtanh_ref(x_bf16)
    assert out_b.dtype == jnp.bfloat16
    assert jnp.allclose(out_b.astype(jnp.float32), ref_b.astype(jnp.float32),
                        atol=1e-2, rtol=1e-2), "bf16 mismatch"

    # Mid-size path (>= 2 blocks, non-trivial grid).
    x_mid = jax.random.normal(k2, (4, 8, 64, 64), dtype=jnp.float32) * 3.0
    out_m = jax.block_until_ready(leaky_hardtanh(x_mid))
    assert jnp.allclose(out_m, leaky_hardtanh_ref(x_mid), atol=1e-6, rtol=1e-6), "mid mismatch"

    print("KERNEL_OK")
</pallas_src>

<mosaic_0001>
module attributes {stable_mosaic.version = 11 : i64} {
  func.func @_leaky_hardtanh_kernel(%arg0: i32, %arg1: memref<8x128xf32, #tpu.memory_space<vmem>>, %arg2: memref<8x128xf32, #tpu.memory_space<vmem>>) attributes {dimension_semantics = [#tpu.dimension_semantics<parallel>], iteration_bounds = array<i64: 2>, scalar_prefetch = 0 : i64, scratch_operands = 0 : i64, tpu.core_type = #tpu.core_type<tc>, window_params = [{transform_indices = @transform_0, window_bounds = array<i64: 8, 128>}, {transform_indices = @transform_1, window_bounds = array<i64: 8, 128>}]} {
    %c0 = arith.constant 0 : index
    %c0_0 = arith.constant 0 : index
    %0 = vector.load %arg1[%c0, %c0_0] : memref<8x128xf32, #tpu.memory_space<vmem>>, vector<8x128xf32>
    %cst = arith.constant 0.00999999977 : f32
    %1 = vector.broadcast %cst : f32 to vector<8x128xf32>
    %2 = arith.mulf %0, %1 : vector<8x128xf32>
    %cst_1 = arith.constant -1.000000e+00 : f32
    %3 = vector.broadcast %cst_1 : f32 to vector<8x128xf32>
    %4 = arith.cmpf olt, %0, %3 : vector<8x128xf32>
    %cst_2 = arith.constant -1.000000e+00 : f32
    %5 = vector.broadcast %cst_2 : f32 to vector<8x128xf32>
    %6 = arith.addf %5, %2 : vector<8x128xf32>
    %7 = arith.select %4, %6, %0 : vector<8x128xi1>, vector<8x128xf32>
    %cst_3 = arith.constant 1.000000e+00 : f32
    %8 = vector.broadcast %cst_3 : f32 to vector<8x128xf32>
    %9 = arith.cmpf ogt, %0, %8 : vector<8x128xf32>
    %cst_4 = arith.constant 1.000000e+00 : f32
    %10 = vector.broadcast %cst_4 : f32 to vector<8x128xf32>
    %11 = arith.addf %10, %2 : vector<8x128xf32>
    %12 = arith.select %9, %11, %7 : vector<8x128xi1>, vector<8x128xf32>
    %c0_5 = arith.constant 0 : index
    %c0_6 = arith.constant 0 : index
    %13 = vector.load %arg2[%c0_5, %c0_6] : memref<8x128xf32, #tpu.memory_space<vmem>>, vector<8x128xf32>
    tpu.vector_store %arg2[%c0_5, %c0_6], %12 {strides = array<i32>} : memref<8x128xf32, #tpu.memory_space<vmem>>, vector<8x128xf32>,
    return
  }
  func.func @transform_0(%arg0: i32) -> (i32, i32) {
    %c0_i32 = arith.constant 0 : i32
    %c0_i32_0 = arith.constant 0 : i32
    return %arg0, %c0_i32 : i32, i32
  }
  func.func @transform_1(%arg0: i32) -> (i32, i32) {
    %c0_i32 = arith.constant 0 : i32
    %c0_i32_0 = arith.constant 0 : i32
    return %arg0, %c0_i32 : i32, i32
  }
}

</mosaic_0001>

<bundles_post_ra>
// kernel: tpu_custom_call.1
= control target key start
LH: loop header
LB: loop body
LE: loop exit
PB: predicated region body
PF: predicated region fallthrough
CT: control target
= control target key end

     0   :  { %6 = vsyncpa [#allocation3], 0  ;;  %s522_s0 = inlined_call_operand.hbm [shape: f32[16,128], index: 0, kind: input, shape index: {}]   ;;  %s523_s1 = inlined_call_operand.hbm [shape: f32[16,128], index: 1, kind: output, shape index: {}]  }
   0x1   :  { %8 = vsyncpa [#allocation3 + $0x1], 0 }
   0x2   :  { %9 = vsyncpa [#allocation4], 0 }
   0x3   :  { %11 = vsyncpa [#allocation4 + $0x1], 0  ;;  %s395_s6 = smov 0   ;;  %s397_s7 = smov 0  }
   0x4   :  { %s399_s8 = smov 0   ;;  %s401_s9 = smov 0  }
   0x5 LB: > { %s416_s10 = sadd.s32 4294967295, %s383_s9   ;;  %s229_s11 = sadd.s32 4294967294, %s383_s9   ;;  %s383_s9 = sphi %s401_s9, %s533_s9   ;;  %s379_s8 = sphi %s399_s8, %s532_s8   ;;  %s375_s7 = sphi %s397_s7, %s531_s7   ;;  %s371_s6 = sphi %s395_s6, %s530_s6  }
   0x6   : > { %s420_s12 = sadd.s32 1, %s383_s9   ;;  %s24_s13 = sadd.s32 1, %s379_s8 }
   0x7   : > { %s21_s14 = ssub.s32 %s383_s9, %s420_s12  ;;  %p31_p0 = scmp.ne.s32.totalorder %s379_s8, %s375_s7 }
   0x8   : > { %p22_p1 = scmp.eq.s32.totalorder %s21_s14, 0  ;;  %p32_p2 = scmp.eq.s32.totalorder %s383_s9, 0 }
   0x9   : > { %p37_p3 = scmp.ne.s32.totalorder %s375_s7, %s371_s6  ;;  %p38_p4 = scmp.eq.s32.totalorder %s416_s10, 0 }
   0xa   : > { %s432_s15 = scalar_select %p22_p1, %s379_s8, %s24_s13  }
   0xb   : > { %p434_p5 = por %p32_p2, %p31_p0  ;;  %p438_p6 = por %p38_p4, %p37_p3 }
   0xc   : > { %p61_p7 = scmp.eq.s32.totalorder %s416_s10, 1  ;;  %p67_p8 = scmp.eq.s32.totalorder %s229_s11, 1 }
   0xd   : > { %p253_p10 = scmp.lt.s32.totalorder %s383_s9, 2  ;;  %s87_s20 = sand.u32 1, %s379_s8  }
   0xe   : > { %p445_p11 = por %p61_p7, %p31_p0  ;;  %p449_p12 = por %p67_p8, %p37_p3 }
   0xf   : > { %s233_s21 = sshll.u32 %s383_s9, 3  ;;  %s232_s22 = sshll.u32 %s87_s20, 3 }
  0x10   : > { %s95_s25 = scalar_lea.hbm %s522_s0, %s233_s21  ;;  %s91_s27 = scalar_lea.vmem [#allocation2], %s232_s22 }
  0x11   : > { %s97_s26 = sshll.u32 %s95_s25, 4  ;;  %s99_s28 = sshll.u32 %s91_s27, 4  ;;  %s98_s26 = int_to_ptr.hbm [resolvable:$true] %s97_s26  ;;  %s100_s28 = int_to_ptr.vmem [resolvable:$true] %s99_s28 }
  0x12   : > { %p460_p13 = pnand %p253_p10, %p434_p5  ;;  %p234_p0 = scmp.ge.s32.totalorder %s383_s9, 1 }
  0x13   : > { %p104_p1 = scmp.lt.s32.totalorder %s383_s9, 3  ;;  %s88_s30 = scalar_lea.sflag [#allocation3], %s87_s20 }
  0x14   : > { %s287_s2 = sshra.s32 %s98_s26, 4  ;;  %p291_p3 = pneg %p460_p13  ;;  %s288_s2 = int_to_ptr.hbm [resolvable:$true] %s287_s2 }
  0x15   : > { %s289_s3 = scalar_lea.hbm %s288_s2, 8  ;;  %s294_s11 = scalar_lea.hbm %s522_s0, 16 }
  0x16   : > { %p290_p2 = scmp.ne.s32.totalorder %s288_s2, %s289_s3  ;;  %p295_p5 = scmp.lt.s32.totalorder %s288_s2, %s522_s0 }
  0x17   : > { %p296_p8 = scmp.lt.s32.totalorder %s294_s11, %s289_s3 }
  0x18   : > { %p292_p4 = pnand %p291_p3, %p290_p2 }
  0x19   : > { %p297_p10 = por %p296_p8, %p295_p5 }
  0x1a   : > { %p293_p7 = pneg %p292_p4 }
  0x1c   : > { %p298_p9 = pnand %p297_p10, %p293_p7 }
  0x1e   : > { %301 = shalt.err (!%p298_p9)
}
  0x1f   : > { %248 = dma.hbm_to_vmem [thread:$0]  (!%p460_p13), %s98_s26, 128, %s100_s28, %s88_s30  }
  0x20   : > { %p105_p2 = pnand %p234_p0, %p104_p1 }
  0x21   : > { %s481_s16 = sand.u32 (!%p105_p2), 1, %s375_s7  }
  0x22   : > { %108 = sbr.rel (%p105_p2) target bundleno = 55 (0x37), region = 24  ;;  %s235_s20 = sshll.u32 (!%p105_p2), %s481_s16, 3 }
  0x23   : > { %s111_s21 = scalar_lea.sflag (!%p105_p2), [#allocation3], %s481_s16  ;;  %s114_s22 = scalar_lea.vmem (!%p105_p2), [#allocation2], %s235_s20 }
  0x27   : > { %362 = dma.done.wait (%p438_p6), %s111_s21, 128  }
  0x28   : > { %364 = vsyncadd (%p438_p6), %s111_s21, 4294967168  ;;  %s238_s23 = sshll.u32 %s416_s10, 3  ;;  %v134_v0 = vld [vmem:[%s114_s22] sm:$0xff]  ;;  %s133_s27 = scalar_lea.vmem [#allocation5], %s235_s20 }
  0x29   : > { %s154_s26 = scalar_lea.hbm %s523_s1, %s238_s23  ;;  %v135_v1 = vmul.f32 0.01, %v134_v0  ;;  %vm136_vm0 = vcmp.lt.f32.partialorder %v134_v0, -1.0  ;;  %s156_s28 = sshll.u32 %s133_s27, 4  ;;  %vm139_vm1 = vcmp.gt.f32.partialorder %v134_v0, 1.0  ;;  %s157_s28 = int_to_ptr.vmem [resolvable:$true] %s156_s28 }
  0x2a   : > { %s158_s29 = sshll.u32 %s154_s26, 4  ;;  %s144_s10 = scalar_lea.sflag [#allocation4], %s481_s16  ;;  %s159_s29 = int_to_ptr.hbm [resolvable:$true] %s158_s29 }
  0x2b   : > { %v137_v2 = vadd.f32 -1.0, %v135_v1  ;;  %v140_v3 = vadd.f32 1.0, %v135_v1  ;;  %s331_s17 = sshra.s32 %s159_s29, 4  ;;  %s337_s4 = scalar_lea.hbm %s523_s1, 16  ;;  %s332_s17 = int_to_ptr.hbm [resolvable:$true] %s331_s17 }
  0x2c   : > { %s333_s30 = scalar_lea.hbm %s332_s17, 8  ;;  %p338_p0 = scmp.lt.s32.totalorder %s332_s17, %s523_s1 }
  0x2d   : > { %v138_v4 = vsel %vm136_vm0, %v137_v2, %v134_v0  ;;  %p334_p6 = scmp.ne.s32.totalorder %s332_s17, %s333_s30  ;;  %p339_p1 = scmp.lt.s32.totalorder %s337_s4, %s333_s30 }
  0x2e   : > { %v141_v5 = vsel %vm139_vm1, %v140_v3, %v138_v4 }
  0x2f   : > { %142 = vst [vmem:[%s133_s27] sm:$0xff] %v141_v5  ;;  %p335_p9 = pnand %p334_p6, %p445_p11  ;;  %p340_p3 = por %p339_p1, %p338_p0 }
  0x31   : > { %p336_p13 = pneg %p335_p9 }
  0x33   : > { %p341_p4 = pnand %p340_p3, %p336_p13 }
  0x35   : > { %344 = shalt.err (!%p341_p4)
}
  0x36   : > { %243 = dma.vmem_to_hbm [thread:$0]  (%p445_p11), %s157_s28, 128, %s159_s29, %s144_s10  }
  0x37 PF: > { %s170_s13 = sand.u32 1, %s371_s6   ;;  %p529_p7 = scmp.ge.s32.totalorder %s383_s9, 2 }
  0x38   : > { %s171_s14 = scalar_lea.sflag [#allocation4], %s170_s13 }
  0x39   : > { %p250_p5 = pnand %p529_p7, %p449_p12 }
  0x3b   : > { %p251_p8 = pneg %p250_p5 }
  0x3d   : > { %366 = dma.done.wait (%p251_p8), %s171_s14, 128  }
  0x3e   : > { %368 = vsyncadd (%p251_p8), %s171_s14, 4294967168  ;;  %p14_p10 = scmp.ge.s32.totalorder %s420_s12, 4   ;;  %s530_s6 = smov %s375_s7 }
  0x3f   : > { %s531_s7 = smov %s379_s8  ;;  %s532_s8 = smov %s432_s15 }
  0x40   : > { %s533_s9 = smov %s420_s12  ;;  %16 = sbr.rel (!%p14_p10) target bundleno = 5 (0x5), region = 69 }
  0x45   :  { %177 = vsyncpa [#allocation3], 1 }
  0x46   :  { %179 = vsyncpa [#allocation3 + $0x1], 1 }
  0x47   :  { %180 = vsyncpa [#allocation4], 1 }
  0x48   :  { %182 = vsyncpa [#allocation4 + $0x1], 1 }

</bundles_post_ra>
